<compile_context>
chip_gen: v7x
topology: tpu7x:2x2x1
jax: 0.10.0
libtpu: 0.0.40
codegen_flags: <defaults>
</compile_context>

<pallas_src>
import jax
import jax.numpy as jnp
from jax.experimental import pallas as pl
from jax.experimental.pallas import tpu as pltpu

DX = 3  # translation (x, y, z)
DQ = 4  # quaternion  (w, x, y, z)


def pose_loss_kernel(packed_ref, out_ref):
    # packed_ref: (B, 14) = [pred_x(3) | pred_q(4) | target_x(3) | target_q(4)]
    # Static ref slices -> loads from the single VMEM tile (no extra DMA).
    px = packed_ref[:, 0:DX].astype(jnp.float32)                    # (B, 3)
    pq = packed_ref[:, DX:DX + DQ].astype(jnp.float32)              # (B, 4)
    tx = packed_ref[:, DX + DQ:2 * DX + DQ].astype(jnp.float32)     # (B, 3)
    tq = packed_ref[:, 2 * DX + DQ:2 * (DX + DQ)].astype(jnp.float32)  # (B, 4)

    # F.normalize(pred_q, p=2, dim=1): x / max(||x||, 1e-12)
    # == x * rsqrt(max(||x||^2, 1e-24)); single EUP op instead of sqrt + div.
    sumsq = jnp.sum(pq * pq, axis=1, keepdims=True)                 # (B, 1)
    inv = jax.lax.rsqrt(jnp.maximum(sumsq, 1e-24))
    pqn = pq * inv

    # L1 losses with 'mean' reduction -> (1, 1) values.
    nx = px.shape[0] * px.shape[1]
    nq = pq.shape[0] * pq.shape[1]
    loss_x = jnp.sum(jnp.abs(px - tx), keepdims=True) * (1.0 / nx)   # (1, 1)
    loss_q = jnp.sum(jnp.abs(pqn - tq), keepdims=True) * (1.0 / nq)  # (1, 1)

    # Single output block: lane 0 = loss_x, lane 1 = loss_q, rest zero.
    lane = jax.lax.broadcasted_iota(jnp.int32, out_ref.shape, 1)
    out_ref[...] = jnp.where(lane == 0, loss_x,
                             jnp.where(lane == 1, loss_q, 0.0))


@jax.jit
def pose_loss(pred_x, pred_q, target_x, target_q, sx, sq):
    """Returns (loss, loss_x, loss_q) as float32 scalars (matches forward())."""
    # Pack the four pose tensors into one array -> one input DMA.
    packed = jnp.concatenate(
        [pred_x, pred_q, target_x, target_q], axis=1).astype(jnp.float32)

    vmem_spec = pl.BlockSpec(memory_space=pltpu.MemorySpace.VMEM)

    out = pl.pallas_call(
        pose_loss_kernel,
        out_shape=jax.ShapeDtypeStruct((1, 8), jnp.float32),
        in_specs=[vmem_spec],
        out_specs=vmem_spec,
    )(packed)

    loss_x = out[0, 0]
    loss_q = out[0, 1]

    # Scalar homoscedastic-uncertainty combine: 2 exps + 4 adds, fused by XLA.
    sx_s = sx[0].astype(jnp.float32)
    sq_s = sq[0].astype(jnp.float32)
    loss = jnp.exp(-sx_s) * loss_x + sx_s + jnp.exp(-sq_s) * loss_q + sq_s
    return loss, loss_x, loss_q


def pose_loss_ref(pred_x, pred_q, target_x, target_q, sx, sq):
    """Pure-JAX reference matching the PyTorch forward."""
    norm = jnp.sqrt(jnp.sum(pred_q * pred_q, axis=1, keepdims=True))
    pqn = pred_q / jnp.maximum(norm, 1e-12)
    loss_x = jnp.mean(jnp.abs(pred_x - target_x))
    loss_q = jnp.mean(jnp.abs(pqn - target_q))
    loss = jnp.exp(-sx[0]) * loss_x + sx[0] + jnp.exp(-sq[0]) * loss_q + sq[0]
    return loss, loss_x, loss_q


if __name__ == "__main__":
    key = jax.random.PRNGKey(0)
    k1, k2, k3, k4 = jax.random.split(key, 4)

    B = 8  # batch

    pred_x = jax.random.normal(k1, (B, DX), dtype=jnp.float32)
    pred_q = jax.random.normal(k2, (B, DQ), dtype=jnp.float32)
    target_x = jax.random.normal(k3, (B, DX), dtype=jnp.float32)
    target_q = jax.random.normal(k4, (B, DQ), dtype=jnp.float32)

    # nn.Parameter(torch.Tensor([sx])) / ([sq]) with the module defaults.
    sx = jnp.array([0.0], dtype=jnp.float32)
    sq = jnp.array([0.0], dtype=jnp.float32)

    loss, loss_x, loss_q = pose_loss(pred_x, pred_q, target_x, target_q, sx, sq)
    jax.block_until_ready(loss)

    ref_loss, ref_lx, ref_lq = pose_loss_ref(
        pred_x, pred_q, target_x, target_q, sx, sq)

    assert jnp.allclose(loss, ref_loss, atol=1e-5, rtol=1e-5), (loss, ref_loss)
    assert jnp.allclose(loss_x, ref_lx, atol=1e-5, rtol=1e-5), (loss_x, ref_lx)
    assert jnp.allclose(loss_q, ref_lq, atol=1e-5, rtol=1e-5), (loss_q, ref_lq)

    print("KERNEL_OK")
</pallas_src>

<mosaic_0001>
module attributes {stable_mosaic.version = 11 : i64} {
  func.func @pose_loss_kernel(%arg0: memref<8x14xf32, #tpu.memory_space<vmem>>, %arg1: memref<1x8xf32, #tpu.memory_space<vmem>>) attributes {dimension_semantics = [], scalar_prefetch = 0 : i64, scratch_operands = 0 : i64, tpu.core_type = #tpu.core_type<tc>} {
    %c0 = arith.constant 0 : index
    %c0_0 = arith.constant 0 : index
    %0 = vector.load %arg0[%c0, %c0_0] : memref<8x14xf32, #tpu.memory_space<vmem>>, vector<8x3xf32>
    %c0_1 = arith.constant 0 : index
    %c3 = arith.constant 3 : index
    %1 = vector.load %arg0[%c0_1, %c3] : memref<8x14xf32, #tpu.memory_space<vmem>>, vector<8x4xf32>
    %c0_2 = arith.constant 0 : index
    %c7 = arith.constant 7 : index
    %2 = vector.load %arg0[%c0_2, %c7] : memref<8x14xf32, #tpu.memory_space<vmem>>, vector<8x3xf32>
    %c0_3 = arith.constant 0 : index
    %c10 = arith.constant 10 : index
    %3 = vector.load %arg0[%c0_3, %c10] : memref<8x14xf32, #tpu.memory_space<vmem>>, vector<8x4xf32>
    %4 = arith.mulf %1, %1 : vector<8x4xf32>
    %cst = arith.constant dense<0.000000e+00> : vector<8xf32>
    %5 = vector.multi_reduction <add>, %4, %cst [1] : vector<8x4xf32> to vector<8xf32>
    %6 = vector.shape_cast %5 : vector<8xf32> to vector<8x1xf32>
    %cst_4 = arith.constant 1.000000e-24 : f32
    %7 = vector.broadcast %cst_4 : f32 to vector<8x1xf32>
    %8 = arith.maximumf %6, %7 : vector<8x1xf32>
    %9 = math.rsqrt %8 : vector<8x1xf32>
    %10 = vector.broadcast %9 : vector<8x1xf32> to vector<8x4xf32>
    %11 = arith.mulf %1, %10 : vector<8x4xf32>
    %12 = arith.subf %0, %2 : vector<8x3xf32>
    %13 = math.absf %12 : vector<8x3xf32>
    %14 = vector.shape_cast %13 : vector<8x3xf32> to vector<1x8x3xf32>
    %cst_5 = arith.constant dense<0.000000e+00> : vector<1xf32>
    %15 = vector.multi_reduction <add>, %14, %cst_5 [1, 2] : vector<1x8x3xf32> to vector<1xf32>
    %16 = vector.shape_cast %15 : vector<1xf32> to vector<1x1x1xf32>
    %17 = vector.extract %16[0, 0, 0] : f32 from vector<1x1x1xf32>
    %18 = vector.broadcast %17 : f32 to vector<1x1xf32>
    %cst_6 = arith.constant 0.0416666679 : f32
    %19 = vector.broadcast %cst_6 : f32 to vector<1x1xf32>
    %20 = arith.mulf %18, %19 : vector<1x1xf32>
    %21 = arith.subf %11, %3 : vector<8x4xf32>
    %22 = math.absf %21 : vector<8x4xf32>
    %23 = vector.shape_cast %22 : vector<8x4xf32> to vector<1x8x4xf32>
    %cst_7 = arith.constant dense<0.000000e+00> : vector<1xf32>
    %24 = vector.multi_reduction <add>, %23, %cst_7 [1, 2] : vector<1x8x4xf32> to vector<1xf32>
    %25 = vector.shape_cast %24 : vector<1xf32> to vector<1x1x1xf32>
    %26 = vector.extract %25[0, 0, 0] : f32 from vector<1x1x1xf32>
    %27 = vector.broadcast %26 : f32 to vector<1x1xf32>
    %cst_8 = arith.constant 3.125000e-02 : f32
    %28 = vector.broadcast %cst_8 : f32 to vector<1x1xf32>
    %29 = arith.mulf %27, %28 : vector<1x1xf32>
    %30 = tpu.iota {dimensions = array<i32: 1>} : vector<1x8xi32>
    %c0_i32 = arith.constant 0 : i32
    %31 = vector.broadcast %c0_i32 : i32 to vector<1x8xi32>
    %32 = arith.cmpi eq, %30, %31 : vector<1x8xi32>
    %c1_i32 = arith.constant 1 : i32
    %33 = vector.broadcast %c1_i32 : i32 to vector<1x8xi32>
    %34 = arith.cmpi eq, %30, %33 : vector<1x8xi32>
    %cst_9 = arith.constant 0.000000e+00 : f32
    %35 = vector.shape_cast %29 : vector<1x1xf32> to vector<1x1xf32>
    %36 = vector.broadcast %35 : vector<1x1xf32> to vector<1x8xf32>
    %37 = vector.broadcast %cst_9 : f32 to vector<1x8xf32>
    %38 = arith.select %34, %36, %37 : vector<1x8xi1>, vector<1x8xf32>
    %39 = vector.shape_cast %20 : vector<1x1xf32> to vector<1x1xf32>
    %40 = vector.broadcast %39 : vector<1x1xf32> to vector<1x8xf32>
    %41 = arith.select %32, %40, %38 : vector<1x8xi1>, vector<1x8xf32>
    %c0_10 = arith.constant 0 : index
    %c0_11 = arith.constant 0 : index
    %42 = vector.load %arg1[%c0_10, %c0_11] : memref<1x8xf32, #tpu.memory_space<vmem>>, vector<1x8xf32>
    tpu.vector_store %arg1[%c0_10, %c0_11], %41 {strides = array<i32>} : memref<1x8xf32, #tpu.memory_space<vmem>>, vector<1x8xf32>,
    return
  }
}

</mosaic_0001>

<bundles_post_ra>
// kernel: pose_loss.1
= control target key start
LH: loop header
LB: loop body
LE: loop exit
PB: predicated region body
PF: predicated region fallthrough
CT: control target
= control target key end

     0   :  { %s78_s8 = smov 121   ;;  %s79_s9 = smov 125   ;;  %vm14_vm0 = vcmask 31744   ;;  %vm27_vm1 = vcmask 23552   ;;  %v58_v30 = vlaneseq  ;;  %vm64_vm4 = vcmask 57344   ;;  %s98_s0 = inlined_call_operand.vmem [shape: f32[8,14], index: 0, kind: input, shape index: {}]   ;;  %s99_s1 = inlined_call_operand.vmem [shape: f32[1,8], index: 1, kind: output, shape index: {}]  }
   0x1   :  { %v8_v0 = vld [vmem:[%s98_s0] sm:$0xff] }
   0x2   :  { %v9_v1 = vmul.f32 %v8_v0, %v8_v0  ;;  %22 = vrot.lane.b32.xlu1 %v8_v0, %s78_s8  ;;  %v59_v31 = vand.u32 127, %v58_v30 }
   0x4   :  { %11 = vrot.lane.b32.xlu0 %v9_v1, %s79_s9  ;;  %vm61_vm2 = vcmp.eq.s32.totalorder %v59_v31, 1  ;;  %vm60_vm3 = vcmp.eq.s32.totalorder %v59_v31, 0 }
  0x74   :  { %v23_v7 = vpop.permute.xlu1 %22 }
  0x75   :  { %v25_v11 = vsub.f32 %v8_v0, %v23_v7 }
  0x76   :  { %v12_v2 = vpop.permute.xlu0 %11 }
  0x77   :  { %v15_v3 = vsel %vm14_vm0, %v12_v2, 0.0  ;;  %v26_v12 = vand.u32 2147483647, %v25_v11 }
  0x78   :  { %16 = vadd.xlane.f32.xlu0 %v15_v3 }
  0x79   :  { %v28_v13 = vsel %vm27_vm1, %v26_v12, 0.0 }
 0x105   :  { %v17_v4 = vpop.xlane.xlu0 %16 }
 0x106   :  { %v18_v5 = vmax.f32 %v17_v4, 1e-24 }
 0x108   :  { %76 = vrsqrt.f32 %v18_v5 }
 0x112   :  { %v77_v6 = vpop.eup %76 }
 0x113   :  { %v20_v8 = vmul.f32 %v77_v6, %v8_v0 }
 0x115   :  { %v40_v9 = vsub.f32 %v20_v8, %v23_v7 }
 0x117   :  { %v41_v10 = vand.u32 2147483647, %v40_v9 }
 0x119   :  { %43 = vrot.lane.b32.xlu1 %v41_v10, %s79_s9 }
 0x13d   :  { %29 = vadd.xlane.f32.xlu1 %v28_v13 }
 0x18b   :  { %v44_v14 = vpop.permute.xlu1 %43 }
 0x18c   :  { %v46_v15 = vsel %vm14_vm0, %v44_v14, 0.0 }
 0x18d   :  { %47 = vadd.xlane.f32.xlu0 %v46_v15 }
 0x1ca   :  { %v30_v16 = vpop.xlane.xlu1 %29 }
 0x1cb   :  { %v31_v17 = vrot.slane %v30_v16, 4 }
 0x1cd   :  { %v32_v18 = vadd.f32 %v31_v17, %v30_v16 }
 0x1cf   :  { %v33_v19 = vrot.slane %v32_v18, 2 }
 0x1d1   :  { %v34_v20 = vadd.f32 %v33_v19, %v32_v18 }
 0x1d3   :  { %v35_v21 = vrot.slane %v34_v20, 1 }
 0x1d5   :  { %v36_v22 = vadd.f32 %v35_v21, %v34_v20 }
 0x1d7   :  { %70 = vpush %v36_v22 }
 0x208   :  { %s71_s0 = spop %70 }
 0x209   :  { %v38_v32 = vstv %s71_s0 }
 0x20a   :  { %v39_v35 = vmul.f32 0.041666668, %v38_v32 }
 0x21a   :  { %v48_v23 = vpop.xlane.xlu0 %47 }
 0x21b   :  { %v49_v24 = vrot.slane %v48_v23, 4 }
 0x21d   :  { %v50_v25 = vadd.f32 %v49_v24, %v48_v23 }
 0x21f   :  { %v51_v26 = vrot.slane %v50_v25, 2 }
 0x221   :  { %v52_v27 = vadd.f32 %v51_v26, %v50_v25 }
 0x223   :  { %v53_v28 = vrot.slane %v52_v27, 1 }
 0x225   :  { %v54_v29 = vadd.f32 %v53_v28, %v52_v27 }
 0x227   :  { %72 = vpush %v54_v29 }
 0x258   :  { %s73_s10 = spop %72 }
 0x259   :  { %v56_v33 = vstv %s73_s10 }
 0x25a   :  { %v57_v34 = vmul.f32 0.03125, %v56_v33 }
 0x25c   :  { %v62_v36 = vsel %vm61_vm2, %v57_v34, 0.0 }
 0x25d   :  { %v63_v37 = vsel %vm60_vm3, %v39_v35, %v62_v36 }
 0x25e   :  { %65 = vst.msk [vmem:[%s99_s1] sm:$0x1] %vm64_vm4, %v63_v37 }

</bundles_post_ra>
